<compile_context>
chip_gen: v7x
topology: tpu7x:2x2x1
jax: 0.10.0
libtpu: 0.0.40
codegen_flags: <defaults>
</compile_context>

<pallas_src>
import functools

import jax
import jax.numpy as jnp
from jax.experimental import pallas as pl
from jax.experimental.pallas import tpu as pltpu


def _make_divisible(v, divisor, min_value=None):
    if min_value is None:
        min_value = divisor
    new_v = max(min_value, int(v + divisor / 2) // divisor * divisor)
    if new_v < 0.9 * v:
        new_v += divisor
    return new_v


# ----------------------------------------------------------------------------
# Kernels
# ----------------------------------------------------------------------------
def _make_fused_kernel(hw_total):
    """Single-pass kernel: block = (Bt, C, HW); pool, excite, scale fused."""
    inv_hw = 1.0 / float(hw_total)

    def kernel(x_ref, w1t_ref, b1_ref, w2t_ref, b2_ref, o_ref):
        xf = x_ref[...].astype(jnp.float32)               # (Bt, C, HW)
        # squeeze: global average pool over spatial (f32 accumulate)
        y = jnp.sum(xf, axis=-1) * inv_hw                 # (Bt, C)
        # excitation: FC -> ReLU -> FC -> Hardsigmoid  (M = Bt on the MXU)
        h = jnp.dot(y, w1t_ref[...],
                    preferred_element_type=jnp.float32) + b1_ref[...]
        h = jnp.maximum(h, 0.0)                           # (Bt, hidden)
        s = jnp.dot(h, w2t_ref[...],
                    preferred_element_type=jnp.float32) + b2_ref[...]
        s = jnp.clip((s + 3.0) * (1.0 / 6.0), 0.0, 1.0)   # hardsigmoid, (Bt, C)
        # scale (f32 multiply, cast to streaming dtype on store)
        o_ref[...] = (xf * s[:, :, None]).astype(o_ref.dtype)

    return kernel


def _make_two_phase_kernel(hw_total, hw_tile):
    """Two-phase kernel for large (C, HW) slabs.

    grid = (B, 2, n_hw):
      phase 0: accumulate pooled sum over HW tiles into VMEM scratch; compute
               the excitation scale on the last tile.
      phase 1: re-stream the same HW tiles and apply the scale.
    """
    needs_mask = (hw_total % hw_tile) != 0
    inv_hw = 1.0 / float(hw_total)

    def kernel(x_ref, w1t_ref, b1_ref, w2t_ref, b2_ref, o_ref,
               acc_ref, s_ref):
        phase = pl.program_id(1)
        hw_i = pl.program_id(2)
        n_hw = pl.num_programs(2)

        @pl.when(jnp.logical_and(phase == 0, hw_i == 0))
        def _():
            acc_ref[...] = jnp.zeros_like(acc_ref)

        @pl.when(phase == 0)
        def _():
            xf = x_ref[...].astype(jnp.float32)           # (1, C, hw_tile)
            if needs_mask:
                lane = jax.lax.broadcasted_iota(jnp.int32, xf.shape, 2)
                valid = (hw_i * hw_tile + lane) < hw_total
                xf = jnp.where(valid, xf, 0.0)
            acc_ref[...] += jnp.sum(xf, axis=-1)          # (1, C)

        @pl.when(jnp.logical_and(phase == 0, hw_i == n_hw - 1))
        def _():
            y = acc_ref[...] * inv_hw                     # (1, C)
            h = jnp.dot(y, w1t_ref[...],
                        preferred_element_type=jnp.float32) + b1_ref[...]
            h = jnp.maximum(h, 0.0)
            s = jnp.dot(h, w2t_ref[...],
                        preferred_element_type=jnp.float32) + b2_ref[...]
            s_ref[...] = jnp.clip((s + 3.0) * (1.0 / 6.0), 0.0, 1.0)

        @pl.when(phase == 1)
        def _():
            xf = x_ref[...].astype(jnp.float32)
            o_ref[...] = (xf * s_ref[...][:, :, None]).astype(o_ref.dtype)

    return kernel


# ----------------------------------------------------------------------------
# Wrapper
# ----------------------------------------------------------------------------
def _choose_bt(B, bytes_per_elem, target_block_bytes):
    """Largest batch-tile that (a) keeps the block under the byte target,
    (b) divides B, and (c) leaves >= 2 grid steps when B allows (v7x TCs)."""
    bt = max(1, min(B, target_block_bytes // max(1, bytes_per_elem)))
    if B >= 2:
        bt = min(bt, max(1, B // 2))
    while B % bt != 0:
        bt -= 1
    return bt


def se_layer(x, w1, b1, w2, b2, *,
             target_block_bytes=2 * 1024 * 1024,
             max_single_phase_block_bytes=6 * 1024 * 1024):
    """x: (B, C, H, W), f32 or bf16.  PyTorch nn.Linear weight layout:
       w1: (hidden, C), b1: (hidden,), w2: (C, hidden), b2: (C,)."""
    B, C, H, W = x.shape
    hidden = w1.shape[0]
    HW = H * W
    itemsize = x.dtype.itemsize
    bytes_per_elem = C * HW * itemsize

    x_flat = x.reshape(B, C, HW)
    w1t = w1.T.astype(jnp.float32)            # (C, hidden)
    w2t = w2.T.astype(jnp.float32)            # (hidden, C)
    b1r = b1.reshape(1, hidden).astype(jnp.float32)
    b2r = b2.reshape(1, C).astype(jnp.float32)

    # Explicit VMEM budget: > v5e's 16 MiB default, safe within v7x's 64 MiB.
    vmem_limit = 32 * 1024 * 1024

    if bytes_per_elem <= max_single_phase_block_bytes:
        # ---------------- fused single-pass path ----------------
        bt = _choose_bt(B, bytes_per_elem, target_block_bytes)
        grid = (B // bt,)
        out_flat = pl.pallas_call(
            _make_fused_kernel(HW),
            out_shape=jax.ShapeDtypeStruct((B, C, HW), x.dtype),
            grid_spec=pltpu.PrefetchScalarGridSpec(
                num_scalar_prefetch=0,
                grid=grid,
                in_specs=[
                    pl.BlockSpec((bt, C, HW), lambda i: (i, 0, 0)),   # x
                    pl.BlockSpec((C, hidden), lambda i: (0, 0)),      # w1^T
                    pl.BlockSpec((1, hidden), lambda i: (0, 0)),      # b1
                    pl.BlockSpec((hidden, C), lambda i: (0, 0)),      # w2^T
                    pl.BlockSpec((1, C), lambda i: (0, 0)),           # b2
                ],
                out_specs=pl.BlockSpec((bt, C, HW), lambda i: (i, 0, 0)),
            ),
            compiler_params=pltpu.CompilerParams(
                dimension_semantics=("parallel",),
                vmem_limit_bytes=vmem_limit),
        )(x_flat, w1t, b1r, w2t, b2r)
    else:
        # ---------------- two-phase HW-tiled fallback ----------------
        hw_tile = max(
            128, (max_single_phase_block_bytes // (C * itemsize)) // 128 * 128)
        hw_tile = min(hw_tile, pl.cdiv(HW, 128) * 128)
        n_hw = pl.cdiv(HW, hw_tile)
        grid = (B, 2, n_hw)
        out_flat = pl.pallas_call(
            _make_two_phase_kernel(HW, hw_tile),
            out_shape=jax.ShapeDtypeStruct((B, C, HW), x.dtype),
            grid_spec=pltpu.PrefetchScalarGridSpec(
                num_scalar_prefetch=0,
                grid=grid,
                in_specs=[
                    pl.BlockSpec((1, C, hw_tile), lambda b, p, h: (b, 0, h)),
                    pl.BlockSpec((C, hidden), lambda b, p, h: (0, 0)),
                    pl.BlockSpec((1, hidden), lambda b, p, h: (0, 0)),
                    pl.BlockSpec((hidden, C), lambda b, p, h: (0, 0)),
                    pl.BlockSpec((1, C), lambda b, p, h: (0, 0)),
                ],
                # phase 0 pins the out block at hw-tile 0 (never written there)
                # so no garbage reaches HBM; phase 1 walks the real tiles.
                out_specs=pl.BlockSpec((1, C, hw_tile),
                                       lambda b, p, h: (b, 0, h * p)),
                scratch_shapes=[
                    pltpu.VMEM((1, C), jnp.float32),   # pooled-sum accumulator
                    pltpu.VMEM((1, C), jnp.float32),   # excitation scale s
                ],
            ),
            compiler_params=pltpu.CompilerParams(
                dimension_semantics=("parallel", "arbitrary", "arbitrary"),
                vmem_limit_bytes=vmem_limit),
        )(x_flat, w1t, b1r, w2t, b2r)

    return out_flat.reshape(B, C, H, W)


# ----------------------------------------------------------------------------
# Pure-JAX reference
# ----------------------------------------------------------------------------
def se_layer_ref(x, w1, b1, w2, b2):
    y = jnp.mean(x, axis=(2, 3))                       # (B, C)
    h = jnp.maximum(y @ w1.T + b1, 0.0)
    s = jnp.clip((h @ w2.T + b2 + 3.0) / 6.0, 0.0, 1.0)
    return x * s[:, :, None, None]


# ----------------------------------------------------------------------------
# Self-test
# ----------------------------------------------------------------------------
if __name__ == "__main__":
    root = jax.random.PRNGKey(0)

    def run_case(case_idx, B, C, H, W, dtype=jnp.float32,
                 atol=1e-5, rtol=1e-5, **se_kwargs):
        hidden = _make_divisible(C // 4, 8)
        ks = jax.random.split(jax.random.fold_in(root, case_idx), 5)
        x = jax.random.normal(ks[0], (B, C, H, W), dtype=jnp.float32).astype(dtype)
        w1 = jax.random.normal(ks[1], (hidden, C), dtype=jnp.float32) * 0.5
        b1 = jax.random.normal(ks[2], (hidden,), dtype=jnp.float32) * 0.1
        w2 = jax.random.normal(ks[3], (C, hidden), dtype=jnp.float32) * 0.5
        b2 = jax.random.normal(ks[4], (C,), dtype=jnp.float32) * 0.1

        out = jax.block_until_ready(se_layer(x, w1, b1, w2, b2, **se_kwargs))
        ref = se_layer_ref(x.astype(jnp.float32), w1, b1, w2, b2)
        assert out.shape == (B, C, H, W)
        assert out.dtype == x.dtype
        assert jnp.allclose(out.astype(jnp.float32), ref, atol=atol, rtol=rtol), (
            f"mismatch vs reference in case {case_idx}")

    # Case 0: canonical toy shape (B=2, C=4, 16x16) -> fused path, 2 grid steps.
    run_case(0, 2, 4, 16, 16)
    # Case 1: batched blocks (Bt=4) with a non-128-aligned spatial extent.
    run_case(1, 8, 16, 12, 12)
    # Case 2: force the two-phase (HW-tiled) path incl. a ragged last tile.
    run_case(2, 2, 8, 15, 15, max_single_phase_block_bytes=4096)
    # Case 3: bf16 streaming (halved HBM traffic); pooling/FC math stays f32.
    run_case(3, 4, 8, 16, 16, dtype=jnp.bfloat16, atol=5e-2, rtol=5e-2)

    print("KERNEL_OK")
</pallas_src>

<mosaic_0001>
module attributes {stable_mosaic.version = 11 : i64} {
  func.func @kernel(%arg0: i32, %arg1: memref<1x4x256xf32, #tpu.memory_space<vmem>>, %arg2: memref<4x8xf32, #tpu.memory_space<vmem>>, %arg3: memref<1x8xf32, #tpu.memory_space<vmem>>, %arg4: memref<8x4xf32, #tpu.memory_space<vmem>>, %arg5: memref<1x4xf32, #tpu.memory_space<vmem>>, %arg6: memref<1x4x256xf32, #tpu.memory_space<vmem>>) attributes {dimension_semantics = [#tpu.dimension_semantics<parallel>], iteration_bounds = array<i64: 2>, scalar_prefetch = 0 : i64, scratch_operands = 0 : i64, tpu.core_type = #tpu.core_type<tc>, window_params = [{transform_indices = @transform_0, window_bounds = array<i64: 1, 4, 256>}, {pipeline_mode = #tpu.pipeline_mode<synchronous>, transform_indices = @transform_1, window_bounds = array<i64: 4, 8>}, {pipeline_mode = #tpu.pipeline_mode<synchronous>, transform_indices = @transform_2, window_bounds = array<i64: 1, 8>}, {pipeline_mode = #tpu.pipeline_mode<synchronous>, transform_indices = @transform_3, window_bounds = array<i64: 8, 4>}, {pipeline_mode = #tpu.pipeline_mode<synchronous>, transform_indices = @transform_4, window_bounds = array<i64: 1, 4>}, {transform_indices = @transform_5, window_bounds = array<i64: 1, 4, 256>}]} {
    %c0 = arith.constant 0 : index
    %c0_0 = arith.constant 0 : index
    %c0_1 = arith.constant 0 : index
    %0 = vector.load %arg1[%c0, %c0_0, %c0_1] : memref<1x4x256xf32, #tpu.memory_space<vmem>>, vector<1x4x256xf32>
    %cst = arith.constant dense<0.000000e+00> : vector<1x4xf32>
    %1 = vector.multi_reduction <add>, %0, %cst [2] : vector<1x4x256xf32> to vector<1x4xf32>
    %cst_2 = arith.constant 3.906250e-03 : f32
    %2 = vector.broadcast %cst_2 : f32 to vector<1x4xf32>
    %3 = arith.mulf %1, %2 : vector<1x4xf32>
    %c0_3 = arith.constant 0 : index
    %c0_4 = arith.constant 0 : index
    %4 = vector.load %arg2[%c0_3, %c0_4] : memref<4x8xf32, #tpu.memory_space<vmem>>, vector<4x8xf32>
    %cst_5 = arith.constant dense<0.000000e+00> : vector<1x8xf32>
    %5 = tpu.matmul %3, %4, %cst_5 {dimension_numbers = #tpu.dot_dimension_numbers<[1], [0], [0], [1], [0, 0, 1, 1], [], []>} : vector<1x4xf32>, vector<4x8xf32>, vector<1x8xf32> -> vector<1x8xf32>
    %c0_6 = arith.constant 0 : index
    %c0_7 = arith.constant 0 : index
    %6 = vector.load %arg3[%c0_6, %c0_7] : memref<1x8xf32, #tpu.memory_space<vmem>>, vector<1x8xf32>
    %7 = arith.addf %5, %6 : vector<1x8xf32>
    %cst_8 = arith.constant 0.000000e+00 : f32
    %8 = vector.broadcast %cst_8 : f32 to vector<1x8xf32>
    %9 = arith.maximumf %7, %8 : vector<1x8xf32>
    %c0_9 = arith.constant 0 : index
    %c0_10 = arith.constant 0 : index
    %10 = vector.load %arg4[%c0_9, %c0_10] : memref<8x4xf32, #tpu.memory_space<vmem>>, vector<8x4xf32>
    %cst_11 = arith.constant dense<0.000000e+00> : vector<1x4xf32>
    %11 = tpu.matmul %9, %10, %cst_11 {dimension_numbers = #tpu.dot_dimension_numbers<[1], [0], [0], [1], [0, 0, 1, 1], [], []>} : vector<1x8xf32>, vector<8x4xf32>, vector<1x4xf32> -> vector<1x4xf32>
    %c0_12 = arith.constant 0 : index
    %c0_13 = arith.constant 0 : index
    %12 = vector.load %arg5[%c0_12, %c0_13] : memref<1x4xf32, #tpu.memory_space<vmem>>, vector<1x4xf32>
    %13 = arith.addf %11, %12 : vector<1x4xf32>
    %cst_14 = arith.constant 3.000000e+00 : f32
    %14 = vector.broadcast %cst_14 : f32 to vector<1x4xf32>
    %15 = arith.addf %13, %14 : vector<1x4xf32>
    %cst_15 = arith.constant 0.166666672 : f32
    %16 = vector.broadcast %cst_15 : f32 to vector<1x4xf32>
    %17 = arith.mulf %15, %16 : vector<1x4xf32>
    %cst_16 = arith.constant 0.000000e+00 : f32
    %cst_17 = arith.constant 1.000000e+00 : f32
    %18 = vector.broadcast %cst_16 : f32 to vector<1x4xf32>
    %19 = arith.maximumf %18, %17 : vector<1x4xf32>
    %20 = vector.broadcast %cst_17 : f32 to vector<1x4xf32>
    %21 = arith.minimumf %20, %19 : vector<1x4xf32>
    %22 = vector.shape_cast %21 : vector<1x4xf32> to vector<1x4x1xf32>
    %23 = vector.broadcast %22 : vector<1x4x1xf32> to vector<1x4x256xf32>
    %24 = arith.mulf %0, %23 : vector<1x4x256xf32>
    %c0_18 = arith.constant 0 : index
    %c0_19 = arith.constant 0 : index
    %c0_20 = arith.constant 0 : index
    %25 = vector.load %arg6[%c0_18, %c0_19, %c0_20] : memref<1x4x256xf32, #tpu.memory_space<vmem>>, vector<1x4x256xf32>
    tpu.vector_store %arg6[%c0_18, %c0_19, %c0_20], %24 {strides = array<i32>} : memref<1x4x256xf32, #tpu.memory_space<vmem>>, vector<1x4x256xf32>,
    return
  }
  func.func @transform_0(%arg0: i32) -> (i32, i32, i32) {
    %c0_i32 = arith.constant 0 : i32
    %c0_i32_0 = arith.constant 0 : i32
    %c0_i32_1 = arith.constant 0 : i32
    return %arg0, %c0_i32, %c0_i32_0 : i32, i32, i32
  }
  func.func @transform_1(%arg0: i32) -> (i32, i32) {
    %c0_i32 = arith.constant 0 : i32
    %c0_i32_0 = arith.constant 0 : i32
    %c0_i32_1 = arith.constant 0 : i32
    return %c0_i32, %c0_i32_0 : i32, i32
  }
  func.func @transform_2(%arg0: i32) -> (i32, i32) {
    %c0_i32 = arith.constant 0 : i32
    %c0_i32_0 = arith.constant 0 : i32
    %c0_i32_1 = arith.constant 0 : i32
    return %c0_i32, %c0_i32_0 : i32, i32
  }
  func.func @transform_3(%arg0: i32) -> (i32, i32) {
    %c0_i32 = arith.constant 0 : i32
    %c0_i32_0 = arith.constant 0 : i32
    %c0_i32_1 = arith.constant 0 : i32
    return %c0_i32, %c0_i32_0 : i32, i32
  }
  func.func @transform_4(%arg0: i32) -> (i32, i32) {
    %c0_i32 = arith.constant 0 : i32
    %c0_i32_0 = arith.constant 0 : i32
    %c0_i32_1 = arith.constant 0 : i32
    return %c0_i32, %c0_i32_0 : i32, i32
  }
  func.func @transform_5(%arg0: i32) -> (i32, i32, i32) {
    %c0_i32 = arith.constant 0 : i32
    %c0_i32_0 = arith.constant 0 : i32
    %c0_i32_1 = arith.constant 0 : i32
    return %arg0, %c0_i32, %c0_i32_0 : i32, i32, i32
  }
}

</mosaic_0001>

<bundles_post_ra>
// kernel: tpu_custom_call.1
= control target key start
LH: loop header
LB: loop body
LE: loop exit
PB: predicated region body
PF: predicated region fallthrough
CT: control target
= control target key end

     0   :  { %10 = vsyncpa [#allocation3], 0  ;;  %s914_s0 = inlined_call_operand.hbm [shape: f32[2,4,256], index: 0, kind: input, shape index: {}]   ;;  %s915_s1 = inlined_call_operand.vmem [shape: f32[4,8], index: 1, kind: input, shape index: {}]   ;;  %s916_s2 = inlined_call_operand.vmem [shape: f32[1,8], index: 2, kind: input, shape index: {}]   ;;  %s917_s3 = inlined_call_operand.vmem [shape: f32[8,4], index: 3, kind: input, shape index: {}]   ;;  %s918_s4 = inlined_call_operand.vmem [shape: f32[1,4], index: 4, kind: input, shape index: {}]   ;;  %s919_s5 = inlined_call_operand.hbm [shape: f32[2,4,256], index: 5, kind: output, shape index: {}]  }
   0x1   :  { %12 = vsyncpa [#allocation3 + $0x1], 0 }
   0x2   :  { %13 = vsyncpa [#allocation4], 0 }
   0x3   :  { %15 = vsyncpa [#allocation4 + $0x1], 0  ;;  %s737_s18 = smov 0   ;;  %s739_s19 = smov 0  }
   0x4   :  { %s741_s20 = smov 0   ;;  %s743_s21 = smov 0  }
   0x5 LB: > { %s758_s22 = sadd.s32 4294967295, %s700_s21   ;;  %s521_s23 = sadd.s32 4294967294, %s700_s21   ;;  %s700_s21 = sphi %s743_s21, %s934_s21   ;;  %s696_s20 = sphi %s741_s20, %s933_s20   ;;  %s692_s19 = sphi %s739_s19, %s932_s19   ;;  %s688_s18 = sphi %s737_s18, %s931_s18  }
   0x6   : > { %s762_s24 = sadd.s32 1, %s700_s21   ;;  %s28_s25 = sadd.s32 1, %s696_s20 }
   0x7   : > { %s25_s26 = ssub.s32 %s700_s21, %s762_s24  ;;  %p35_p0 = scmp.ne.s32.totalorder %s696_s20, %s692_s19 }
   0x8   : > { %p26_p1 = scmp.eq.s32.totalorder %s25_s26, 0  ;;  %p36_p2 = scmp.eq.s32.totalorder %s700_s21, 0 }
   0x9   : > { %p41_p3 = scmp.ne.s32.totalorder %s692_s19, %s688_s18  ;;  %p42_p4 = scmp.eq.s32.totalorder %s758_s22, 0 }
   0xa   : > { %s774_s27 = scalar_select %p26_p1, %s696_s20, %s28_s25  }
   0xb   : > { %p776_p5 = por %p36_p2, %p35_p0  ;;  %p780_p6 = por %p42_p4, %p41_p3 }
   0xc   : > { %p149_p7 = scmp.eq.s32.totalorder %s758_s22, 1  ;;  %p155_p8 = scmp.eq.s32.totalorder %s521_s23, 1 }
   0xd   : > { %p566_p10 = scmp.lt.s32.totalorder %s700_s21, 2  ;;  %s187_s7 = sand.u32 1, %s696_s20  }
   0xe   : > { %p787_p11 = por %p149_p7, %p35_p0  ;;  %p791_p12 = por %p155_p8, %p41_p3 }
   0xf   : > { %s538_s8 = sshll.u32 %s700_s21, 7  ;;  %s524_s9 = sshll.u32 %s187_s7, 3 }
  0x10   : > { %s923_s30 = scalar_select %p787_p11, 1, 0 }
  0x11   : > { %s924_s6 = scalar_select %p791_p12, 1, 0 }
  0x12   : > { %s800_s12 = scalar_lea.hbm %s914_s0, %s538_s8  ;;  %s191_s13 = scalar_lea.vmem [#allocation2], %s524_s9 }
  0x13   : > { %s199_s14 = sshll.u32 %s191_s13, 4  ;;  %p804_p13 = pnand %p566_p10, %p776_p5  ;;  %s808_s14 = int_to_ptr.vmem [resolvable:$true] %s199_s14 }
  0x14   : > { %s188_s16 = scalar_lea.sflag [#allocation3], %s187_s7  ;;  %s604_s17 = scalar_lea.hbm %s800_s12, 128 }
  0x15   : > { %p605_p2 = scmp.ne.s32.totalorder %s800_s12, %s604_s17  ;;  %p606_p3 = pneg %p804_p13 }
  0x16   : > { %s609_s26 = scalar_lea.hbm %s914_s0, 256  ;;  %p610_p5 = scmp.lt.u32.totalorder %s800_s12, %s914_s0 }
  0x17   : > { %p607_p4 = pnand %p606_p3, %p605_p2  ;;  %p611_p8 = scmp.lt.u32.totalorder %s609_s26, %s604_s17 }
  0x18   : > { %p613_p9 = scmp.lt.u32.totalorder %s604_s17, %s800_s12 }
  0x19   : > { %p608_p7 = pneg %p607_p4  ;;  %p612_p10 = por %p611_p8, %p610_p5 }
  0x1b   : > { %p614_p0 = por %p613_p9, %p612_p10 }
  0x1d   : > { %p615_p1 = pnand %p614_p0, %p608_p7 }
  0x1f   : > { %618 = shalt.err (!%p615_p1)
}
  0x20   : > { %s619_s7 = scalar_lea.vmem %s808_s14, 128  ;;  %s702_s9 = smov [#allocation2]  }
  0x21   : > { %p620_p2 = scmp.ne.s32.totalorder %s808_s14, %s619_s7  ;;  %s624_s10 = sshll.u32 %s702_s9, 4  ;;  %s625_s10 = int_to_ptr.vmem [resolvable:$false] %s624_s10 }
  0x22   : > { %s626_s11 = scalar_lea.vmem %s625_s10, 256  ;;  %p627_p11 = scmp.lt.s32.totalorder %s808_s14, %s625_s10 }
  0x23   : > { %p622_p4 = pnand %p620_p2, %p606_p3  ;;  %p628_p5 = scmp.lt.s32.totalorder %s626_s11, %s619_s7 }
  0x25   : > { %p623_p12 = pneg %p622_p4  ;;  %p629_p8 = por %p628_p5, %p627_p11 }
  0x27   : > { %p630_p9 = pnand %p629_p8, %p623_p12 }
  0x29   : > { %633 = shalt.err (!%p630_p9)
}
  0x2a   : > { %561 = dma.hbm_to_vmem [thread:$0]  (!%p804_p13), %s800_s12, 128, %s808_s14, %s188_s16  }
  0x2b   : > { %p926_p0 = scmp.lt.s32.totalorder %s700_s21, 3  ;;  %p927_p1 = scmp.ge.s32.totalorder %s700_s21, 1 }
  0x2d   : > { %p205_p3 = pnand %p927_p1, %p926_p0 }
  0x2e   : > { %s842_s13 = sand.u32 (!%p205_p3), 1, %s692_s19  }
  0x2f   : > { %208 = sbr.rel (%p205_p3) target bundleno = 780 (0x30c), region = 40  ;;  %s528_s17 = sshll.u32 (!%p205_p3), %s842_s13, 3 }
  0x30   : > { %s211_s23 = scalar_lea.sflag (!%p205_p3), [#allocation3], %s842_s13  ;;  %s214_s15 = scalar_lea.vmem (!%p205_p3), [#allocation2], %s528_s17 }
  0x36   : > { %679 = dma.done.wait (%p780_p6), %s211_s23, 128  }
  0x37   : > { %681 = vsyncadd (%p780_p6), %s211_s23, 4294967168  ;;  %vm245_vm0 = vcmask 1043456   ;;  %v241_v0 = vld [vmem:[%s214_s15] sm:$0xff]  ;;  %v703_v5 = vmov 0.0   ;;  %vm704_vm1 = vmmov 0   ;;  %v255_v7 = vlaneseq  ;;  %s539_s7 = sshll.u32 %s758_s22, 7 }
  0x38   : > { %v243_v1 = vcombine.high %v241_v0, %v241_v0  ;;  %v246_v2 = vsel %vm245_vm0, %v241_v0, 0.0  ;;  %544 = vmatprep.subr.mxu0 %v703_v5  ;;  %v252_v6 = vld [vmem:[%s915_s1] sm:$0xf]  ;;  %549 = vmatprep.subr.mxu1 %v703_v5  ;;  %vm261_vm2 = vcmask 31744   ;;  %vm340_vm3 = vcmask 64512   ;;  %s240_s9 = scalar_lea.vmem [#allocation5], %s528_s17  ;;  %s870_s15 = scalar_lea.hbm %s919_s5, %s539_s7 }
  0x39   : > { %545 = vmatpush3.msk.msra.mxu0 %vm245_vm0, %v252_v6  ;;  %546 = vmatprep.mubr.msk.f32.mxu0 %vm704_vm1, %v703_v5  ;;  %v256_v8 = vand.u32 127, %v255_v7  ;;  %v258_v9 = vshrl.u32 %v255_v7, 7  ;;  %v338_v14 = vld [vmem:[%s917_s3] sm:$0xff]  ;;  %v705_v30 = vmov 839922192   ;;  %s451_s10 = sshll.u32 %s240_s9, 4  ;;  %s872_s10 = int_to_ptr.vmem [resolvable:$true] %s451_s10 }
  0x3a   : > { %v247_v3 = vsel %vm245_vm0, %v243_v1, 0.0  ;;  %551 = vmatprep.mubr.msk.f32.mxu1 %vm704_vm1, %v703_v5  ;;  %550 = vmatpush3.msra.mxu1 %v338_v14  ;;  %v253_v15 = vld [vmem:[%s916_s2] sm:$0x1]  ;;  %v427_v31 = vunpack.c.l.s4 %v705_v30  ;;  %s437_s12 = scalar_lea.sflag [#allocation4], %s842_s13  ;;  %s634_s14 = scalar_lea.vmem %s872_s10, 128 }
  0x3b   : > { %v248_v4 = vadd.f32 %v247_v3, %v246_v2  ;;  %v259_v10 = vsub.s32 %v256_v8, %v258_v9  ;;  %v339_v20 = vld [vmem:[%s918_s4] sm:$0x1]  ;;  %v420_v27 = vsub.s32 0, %v258_v9  ;;  %p635_p6 = scmp.ne.s32.totalorder %s872_s10, %s634_s14  ;;  %p928_p11 = scmp.ne.s32.totalorder %s923_s30, 0 }
  0x3c   : > { %v428_v32 = vunpack.c.0.s8 %v427_v31  ;;  %s706_s22 = smov [#allocation5]  }
  0x3d   : > { %249 = vadd.xlane.f32.xlu0 %v248_v4  ;;  %p636_p12 = pnand %p635_p6, %p928_p11  ;;  %s638_s17 = sshll.u32 %s706_s22, 4  ;;  %s639_s17 = int_to_ptr.vmem [resolvable:$false] %s638_s17 }
  0x3e   : > { %v431_v33 = vsub.s32 %v428_v32, %v258_v9  ;;  %s640_s29 = scalar_lea.vmem %s639_s17, 256  ;;  %p641_p7 = scmp.lt.s32.totalorder %s872_s10, %s639_s17 }
  0x3f   : > { %p637_p13 = pneg %p636_p12  ;;  %p642_p10 = scmp.lt.s32.totalorder %s640_s29, %s634_s14 }
  0x41   : > { %p643_p2 = por %p642_p10, %p641_p7 }
  0x43   : > { %p644_p4 = pnand %p643_p2, %p637_p13 }
  0xca   : > { %v250_v11 = vpop.xlane.xlu0 %249 }
  0xcb   : > { %v251_v12 = vmul.f32 0.00390625, %v250_v11 }
  0xcd   : > { %v260_v13 = vrot.slane %v251_v12, %v259_v10 }
  0xcf   : > { %547 = vmatmul.mubr.msk.f32.vlgmr.msra.gmra.mrb[0].mxu0 %vm261_vm2, %v260_v13 }
 0x1a2   : > { %v333_v16 = vpop.f32.mrb[0].mxu0 }
 0x1a3   : > { %v334_v17 = vadd.f32 %v333_v16, %v253_v15  ;;  %v548_v18 = vpop.f32.mrb[1].mxu0 }
 0x1a5   : > { %v337_v19 = vmax.f32 %v334_v17, 0.0 }
 0x1a7   : > { %552 = vmatmul.mubr.msk.f32.vlgmr.msra.gmra.mrb[0].mxu1 %vm340_vm3, %v337_v19 }
 0x27a   : > { %v410_v21 = vpop.f32.mrb[0].mxu1 }
 0x27b   : > { %v411_v22 = vadd.f32 %v410_v21, %v339_v20  ;;  %v553_v23 = vpop.f32.mrb[1].mxu1 }
 0x27d   : > { %v414_v24 = vadd.f32 3.0, %v411_v22 }
 0x27f   : > { %v415_v25 = vmul.f32 0.16666667, %v414_v24 }
 0x281   : > { %v416_v26 = vmax.f32 %v415_v25, 0.0 }
 0x283   : > { %v417_v28 = vmin.f32 %v416_v26, 1.0 }
 0x285   : > { %v421_v29 = vrot.slane %v417_v28, %v420_v27 }
 0x287   : > { %423 = vbcast.lane.b32.xlu0 %v421_v29, 256 }
 0x2f9   : > { %v424_v34 = vpop.permute.xlu0 %423 }
 0x2fa   : > { %v432_v35 = vrot.slane %v424_v34, %v431_v33 }
 0x2fc   : > { %v434_v36 = vmul.f32 %v432_v35, %v241_v0 }
 0x2fe   : > { %435 = vst [vmem:[%s240_s9] sm:$0xff] %v434_v36 }
 0x2ff   : > { %647 = shalt.err (!%p644_p4)
}
 0x300   : > { %s648_s13 = scalar_lea.hbm %s870_s15, 128  ;;  %s652_s26 = scalar_lea.hbm %s919_s5, 256 }
 0x301   : > { %p649_p5 = scmp.ne.s32.totalorder %s870_s15, %s648_s13  ;;  %p653_p0 = scmp.lt.u32.totalorder %s870_s15, %s919_s5 }
 0x302   : > { %p654_p1 = scmp.lt.u32.totalorder %s652_s26, %s648_s13  ;;  %p656_p6 = scmp.lt.u32.totalorder %s648_s13, %s870_s15 }
 0x303   : > { %p650_p8 = pnand %p649_p5, %p928_p11 }
 0x304   : > { %p655_p3 = por %p654_p1, %p653_p0 }
 0x305   : > { %p651_p9 = pneg %p650_p8 }
 0x306   : > { %p657_p12 = por %p656_p6, %p655_p3 }
 0x308   : > { %p658_p13 = pnand %p657_p12, %p651_p9 }
 0x30a   : > { %661 = shalt.err (!%p658_p13)
}
 0x30b   : > { %556 = dma.vmem_to_hbm [thread:$0]  (%p928_p11), %s872_s10, 128, %s870_s15, %s437_s12  }
 0x30c PF: > { %s463_s7 = sand.u32 1, %s688_s18   ;;  %p929_p7 = scmp.ne.s32.totalorder %s924_s6, 0 }
 0x30d   : > { %p930_p10 = scmp.ge.s32.totalorder %s700_s21, 2  ;;  %s464_s9 = scalar_lea.sflag [#allocation4], %s463_s7 }
 0x30f   : > { %p563_p2 = pnand %p930_p10, %p929_p7 }
 0x311   : > { %683 = dma.done.wait (!%p563_p2), %s464_s9, 128  }
 0x312   : > { %685 = vsyncadd (!%p563_p2), %s464_s9, 4294967168  ;;  %p18_p4 = scmp.ge.s32.totalorder %s762_s24, 4   ;;  %s931_s18 = smov %s692_s19 }
 0x313   : > { %s932_s19 = smov %s696_s20  ;;  %s933_s20 = smov %s774_s27 }
 0x314   : > { %s934_s21 = smov %s762_s24  ;;  %20 = sbr.rel (!%p18_p4) target bundleno = 5 (0x5), region = 85 }
 0x31b   :  { %469 = vsyncpa [#allocation3], 1 }
 0x31c   :  { %471 = vsyncpa [#allocation3 + $0x1], 1 }
 0x31d   :  { %472 = vsyncpa [#allocation4], 1 }
 0x31e   :  { %474 = vsyncpa [#allocation4 + $0x1], 1 }

</bundles_post_ra>
